<compile_context>
chip_gen: v7x
topology: tpu7x:2x2x1
jax: 0.10.0
libtpu: 0.0.40
codegen_flags: <defaults>
</compile_context>

<pallas_src>
import functools

import jax
import jax.numpy as jnp
import numpy as np
from jax import lax
from jax.experimental import pallas as pl
from jax.experimental.pallas import tpu as pltpu

BN_EPS = 1e-5
LANE = 128


# ----------------------------------------------------------------------------- utils
def _round_up(x, m):
    return ((x + m - 1) // m) * m


def _itemsize(dtype):
    return np.dtype(dtype).itemsize


def _vmem_budget_bytes():
    """Generation-aware scoped-VMEM budget: ~96 MiB on v5e/v6e (128 MiB physical),
    ~48 MiB on v7x (64 MiB per TensorCore); conservative fallback if query fails."""
    cap = None
    try:
        cap = getattr(pltpu.get_tpu_info(), "vmem_capacity_bytes", None)
    except Exception:
        cap = None
    if not cap:
        cap = 64 * 1024 * 1024
    return min(int(cap) * 3 // 4, 96 * 1024 * 1024)


def _linear_plan(B, k_in, n_out, budget, x_item, w_item, out_item):
    """Pick (tn, tk, x_resident) for a (B,K)x(K,N) layer under the VMEM budget.
    Prefers keeping the whole activation matrix resident in VMEM (fetched once),
    then the largest weight tiles that still fit with double buffering."""
    x_resident = 2 * B * k_in * x_item <= budget // 2   # conservative: 2 buffers
    for tn in (1024, 512, 256, 128):
        if n_out % tn:
            continue
        if tn == n_out and n_out >= 256:   # keep >=2 N-tiles for v7x dual TC
            continue
        for tk in (1024, 512, 256, 128):
            if k_in % tk:
                continue
            x_bytes = 2 * B * (k_in if x_resident else tk) * x_item
            w_bytes = 2 * tk * tn * w_item            # double-buffered weight stream
            o_bytes = 2 * B * tn * out_item
            acc_bytes = B * tn * 4
            misc = 8 * tn * 4                         # gamma/beta/bias buffers
            if x_bytes + w_bytes + o_bytes + acc_bytes + misc <= int(0.85 * budget):
                return tn, tk, x_resident
    # minimal fallback: smallest lane-dense tiles, streamed activations.
    tn = 128 if n_out % 128 == 0 else n_out
    tk = 128 if k_in % 128 == 0 else k_in
    return tn, tk, False


def _pool_plan(B, C, hw, budget):
    """Pick (tb, tc) for pooling; the VMEM footprint uses the lane-padded spatial
    extent round_up(hw, 128) and sublane-padded channel tile."""
    hw_pad = _round_up(hw, LANE)
    tc_cands = [t for t in (512, 256, 128) if C % t == 0] or [C]
    tb_cands = [t for t in (128, 64, 32, 16, 8) if B % t == 0] or [B]
    for tb in tb_cands:
        for tc in tc_cands:
            in_bytes = 2 * tb * _round_up(tc, 8) * hw_pad * 4      # double-buffered
            out_bytes = 2 * 2 * tb * _round_up(tc, LANE) * 4
            if in_bytes + out_bytes <= int(0.85 * budget):
                return tb, tc
    return tb_cands[-1], tc_cands[-1]


# --------------------------------------------------------------------------- kernels
def _pool_kernel(z_ref, avg_ref, max_ref):
    # z block: (tb, tc, H*W) f32, spatial axis on lanes.
    z = z_ref[...]
    avg_ref[...] = jnp.mean(z, axis=-1).astype(avg_ref.dtype)
    max_ref[...] = jnp.max(z, axis=-1).astype(max_ref.dtype)


def _bn_relu_f32(h, gamma, beta):
    # BatchNorm1d training mode: batch statistics, biased variance, f32 math.
    mean = jnp.mean(h, axis=0, keepdims=True)
    var = jnp.mean((h - mean) ** 2, axis=0, keepdims=True)
    hn = (h - mean) * lax.rsqrt(var + BN_EPS) * gamma + beta
    return jnp.maximum(hn, 0.0)


def _linear_bn_relu_kernel(x_ref, w_ref, g_ref, be_ref, o_ref, acc_ref,
                           *, tk, x_resident):
    # grid = (N tiles, K tiles); K accumulation into f32 scratch; BN+relu at last K.
    k = pl.program_id(1)
    if x_resident:
        start = pl.multiple_of(k * tk, tk)
        xk = x_ref[:, pl.ds(start, tk)]
    else:
        xk = x_ref[...]
    prod = jnp.dot(xk, w_ref[...], preferred_element_type=jnp.float32)

    @pl.when(k == 0)
    def _():
        acc_ref[...] = prod                 # no zero-init + RMW pass

    @pl.when(k > 0)
    def _():
        acc_ref[...] += prod

    @pl.when(k == pl.num_programs(1) - 1)
    def _():
        o_ref[...] = _bn_relu_f32(acc_ref[...], g_ref[...], be_ref[...]).astype(o_ref.dtype)


def _linear_bias_kernel(x_ref, w_ref, b_ref, o_ref, acc_ref, *, tk, x_resident):
    k = pl.program_id(1)
    if x_resident:
        start = pl.multiple_of(k * tk, tk)
        xk = x_ref[:, pl.ds(start, tk)]
    else:
        xk = x_ref[...]
    prod = jnp.dot(xk, w_ref[...], preferred_element_type=jnp.float32)

    @pl.when(k == 0)
    def _():
        acc_ref[...] = prod

    @pl.when(k > 0)
    def _():
        acc_ref[...] += prod

    @pl.when(k == pl.num_programs(1) - 1)
    def _():
        o_ref[...] = (acc_ref[...] + b_ref[...]).astype(o_ref.dtype)


# -------------------------------------------------------------------------- wrappers
def _pool(z, compute_dtype, budget):
    """Adaptive avg+max pool to (1,1); returns unpadded (B, C) avg and max."""
    B, C, H, W = z.shape
    hw = H * W
    zf = z.reshape(B, C, hw).astype(jnp.float32)      # no channel padding here
    tb, tc = _pool_plan(B, C, hw, budget)
    grid = (pl.cdiv(B, tb), pl.cdiv(C, tc))
    cost = pl.CostEstimate(
        flops=2 * B * C * hw, transcendentals=0,
        bytes_accessed=int(zf.size * 4 + 2 * B * C * _itemsize(compute_dtype)))
    return pl.pallas_call(
        _pool_kernel,
        out_shape=(jax.ShapeDtypeStruct((B, C), compute_dtype),
                   jax.ShapeDtypeStruct((B, C), compute_dtype)),
        grid_spec=pltpu.PrefetchScalarGridSpec(
            num_scalar_prefetch=0,
            grid=grid,
            in_specs=[pl.BlockSpec((tb, tc, hw), lambda b, c: (b, c, 0))],
            out_specs=(pl.BlockSpec((tb, tc), lambda b, c: (b, c)),
                       pl.BlockSpec((tb, tc), lambda b, c: (b, c)))),
        compiler_params=pltpu.CompilerParams(
            dimension_semantics=("parallel", "parallel"),
            vmem_limit_bytes=budget),
        cost_estimate=cost,
    )(zf)


def _linear_bn_relu(x, w, g, be, compute_dtype, budget):
    B, k_in = x.shape
    n_out = w.shape[1]
    tn, tk, x_resident = _linear_plan(
        B, k_in, n_out, budget,
        x_item=_itemsize(x.dtype), w_item=_itemsize(w.dtype),
        out_item=_itemsize(compute_dtype))
    grid = (n_out // tn, k_in // tk)
    if x_resident:
        x_spec = pl.BlockSpec((B, k_in), lambda n, k: (0, 0))   # fetched once
    else:
        x_spec = pl.BlockSpec((B, tk), lambda n, k: (0, k))
    it = _itemsize(compute_dtype)
    x_reads = 1 if x_resident else (n_out // tn)
    cost = pl.CostEstimate(
        flops=2 * B * k_in * n_out, transcendentals=n_out,
        bytes_accessed=int(x.size * _itemsize(x.dtype) * x_reads
                           + w.size * _itemsize(w.dtype)
                           + (g.size + be.size) * 4 + B * n_out * it))
    kernel = functools.partial(_linear_bn_relu_kernel, tk=tk, x_resident=x_resident)
    return pl.pallas_call(
        kernel,
        out_shape=jax.ShapeDtypeStruct((B, n_out), compute_dtype),
        grid_spec=pltpu.PrefetchScalarGridSpec(
            num_scalar_prefetch=0,
            grid=grid,
            in_specs=[
                x_spec,
                pl.BlockSpec((tk, tn), lambda n, k: (k, n)),   # weight stream
                pl.BlockSpec((1, tn), lambda n, k: (0, n)),    # gamma
                pl.BlockSpec((1, tn), lambda n, k: (0, n)),    # beta
            ],
            out_specs=pl.BlockSpec((B, tn), lambda n, k: (0, n)),
            scratch_shapes=[pltpu.VMEM((B, tn), jnp.float32)]),
        compiler_params=pltpu.CompilerParams(
            dimension_semantics=("parallel", "arbitrary"),
            vmem_limit_bytes=budget),
        cost_estimate=cost,
    )(x, w, g, be)


def _linear_bias(x, w, b, budget):
    B, k_in = x.shape
    n_out = w.shape[1]
    tn, tk, x_resident = _linear_plan(
        B, k_in, n_out, budget,
        x_item=_itemsize(x.dtype), w_item=_itemsize(w.dtype), out_item=4)
    grid = (n_out // tn, k_in // tk)
    if x_resident:
        x_spec = pl.BlockSpec((B, k_in), lambda n, k: (0, 0))
    else:
        x_spec = pl.BlockSpec((B, tk), lambda n, k: (0, k))
    x_reads = 1 if x_resident else (n_out // tn)
    cost = pl.CostEstimate(
        flops=2 * B * k_in * n_out, transcendentals=0,
        bytes_accessed=int(x.size * _itemsize(x.dtype) * x_reads
                           + w.size * _itemsize(w.dtype)
                           + b.size * 4 + B * n_out * 4))
    kernel = functools.partial(_linear_bias_kernel, tk=tk, x_resident=x_resident)
    return pl.pallas_call(
        kernel,
        out_shape=jax.ShapeDtypeStruct((B, n_out), jnp.float32),
        grid_spec=pltpu.PrefetchScalarGridSpec(
            num_scalar_prefetch=0,
            grid=grid,
            in_specs=[
                x_spec,
                pl.BlockSpec((tk, tn), lambda n, k: (k, n)),
                pl.BlockSpec((1, tn), lambda n, k: (0, n)),
            ],
            out_specs=pl.BlockSpec((B, tn), lambda n, k: (0, n)),
            scratch_shapes=[pltpu.VMEM((B, tn), jnp.float32)]),
        compiler_params=pltpu.CompilerParams(
            dimension_semantics=("parallel", "arbitrary"),
            vmem_limit_bytes=budget),
        cost_estimate=cost,
    )(x, w, b)


def barlowtwins_forward(z, prepped, proj_out, compute_dtype=jnp.bfloat16):
    """z: (B, C, H, W) float32 NCHW.  Returns (B, proj_out) float32."""
    budget = _vmem_budget_bytes()
    avg, mx = _pool(z, compute_dtype, budget)
    k1_p = prepped["w1"].shape[0]
    x = jnp.concatenate([avg, mx], axis=-1)            # tiny (B, 2C) concat
    if x.shape[1] != k1_p:
        x = jnp.pad(x, ((0, 0), (0, k1_p - x.shape[1])))
    h1 = _linear_bn_relu(x, prepped["w1"], prepped["g1"], prepped["be1"],
                         compute_dtype, budget)
    h2 = _linear_bn_relu(h1, prepped["w2"], prepped["g2"], prepped["be2"],
                         compute_dtype, budget)
    out = _linear_bias(h2, prepped["w3"], prepped["b3"], budget)
    return out[:, :proj_out]


# ------------------------------------------------------------------ params / reference
def init_params(key, proj_in, proj_hid, proj_out):
    """PyTorch nn.Linear / nn.BatchNorm1d default init at logical sizes (f32).
    Weights are stored pre-transposed as (in_features, out_features)."""
    ks = jax.random.split(key, 6)

    def linear(kw, kb, fan_in, fan_out):
        bound = 1.0 / np.sqrt(fan_in)
        w = jax.random.uniform(kw, (fan_in, fan_out), jnp.float32, -bound, bound)
        b = jax.random.uniform(kb, (1, fan_out), jnp.float32, -bound, bound)
        return w, b

    w1, b1 = linear(ks[0], ks[1], proj_in, proj_hid)
    w2, b2 = linear(ks[2], ks[3], proj_hid, proj_hid)
    w3, b3 = linear(ks[4], ks[5], proj_hid, proj_out)
    return {
        "w1": w1, "b1": b1,
        "g1": jnp.ones((1, proj_hid), jnp.float32),
        "be1": jnp.zeros((1, proj_hid), jnp.float32),
        "w2": w2, "b2": b2,
        "g2": jnp.ones((1, proj_hid), jnp.float32),
        "be2": jnp.zeros((1, proj_hid), jnp.float32),
        "w3": w3, "b3": b3,
    }


def prepare_params(params, compute_dtype=jnp.bfloat16):
    """Pad feature dims to lane-dense multiples of 128, drop b1/b2 (cancelled exactly
    by training-mode BatchNorm batch-mean subtraction), pre-cast matmul weights to
    bf16.  w1 stays a single (2C, hid) matrix (avg/max halves fused)."""
    two_c, hid = params["w1"].shape
    out = params["w3"].shape[1]
    k1_p = _round_up(two_c, LANE)
    h_p = _round_up(hid, LANE)
    o_p = _round_up(out, LANE)

    def pad2(a, rows, cols, dtype=jnp.float32):
        return jnp.pad(a, ((0, rows - a.shape[0]), (0, cols - a.shape[1]))).astype(dtype)

    return {
        "w1": pad2(params["w1"], k1_p, h_p, compute_dtype),
        "g1": pad2(params["g1"], 1, h_p),
        "be1": pad2(params["be1"], 1, h_p),
        "w2": pad2(params["w2"], h_p, h_p, compute_dtype),
        "g2": pad2(params["g2"], 1, h_p),
        "be2": pad2(params["be2"], 1, h_p),
        "w3": pad2(params["w3"], h_p, o_p, compute_dtype),
        "b3": pad2(params["b3"], 1, o_p),
    }


def barlowtwins_reference(z, params, compute_dtype=jnp.bfloat16):
    """Pure-JAX reference (PyTorch training-mode semantics, b1/b2 included) mirroring
    the kernel's mixed-precision policy: bf16 matmul operands, f32 accumulation/BN."""
    B, C, H, W = z.shape
    zf = z.reshape(B, C, H * W).astype(jnp.float32)
    x = jnp.concatenate([jnp.mean(zf, axis=-1), jnp.max(zf, axis=-1)], axis=-1)

    def mm(a, w):
        return jnp.dot(a.astype(compute_dtype), w.astype(compute_dtype),
                       preferred_element_type=jnp.float32)

    def bn_relu(h, g, b):
        m = jnp.mean(h, axis=0, keepdims=True)
        v = jnp.mean((h - m) ** 2, axis=0, keepdims=True)
        return jnp.maximum((h - m) * lax.rsqrt(v + BN_EPS) * g + b, 0.0)

    h1 = bn_relu(mm(x, params["w1"]) + params["b1"], params["g1"], params["be1"])
    h2 = bn_relu(mm(h1, params["w2"]) + params["b2"], params["g2"], params["be2"])
    return mm(h2, params["w3"]) + params["b3"]


# ------------------------------------------------------------------------------ main
if __name__ == "__main__":
    # Small shapes consistent with the module: z is a (B, C, H, W) feature map;
    # pooling gives proj_in = 2*C features per sample.
    B, C, H, W = 2, 4, 16, 16
    proj_in = 2 * C
    proj_hid, proj_out = 32, 32          # config['SSL']['barlowtwins'] proj_hid / proj_out
    compute_dtype = jnp.bfloat16         # MXU operand dtype; BN statistics stay f32

    key = jax.random.PRNGKey(0)
    kz, kp = jax.random.split(key)
    z = jax.random.normal(kz, (B, C, H, W), dtype=jnp.float32)

    params = init_params(kp, proj_in, proj_hid, proj_out)
    prepped = prepare_params(params, compute_dtype)

    out = barlowtwins_forward(z, prepped, proj_out, compute_dtype)
    out = jax.block_until_ready(out)

    ref = barlowtwins_reference(z, params, compute_dtype)
    np.testing.assert_allclose(np.asarray(out), np.asarray(ref), rtol=2e-3, atol=2e-3)

    print("KERNEL_OK")
</pallas_src>

<mosaic_0001>
module attributes {stable_mosaic.version = 11 : i64} {
  func.func @_pool_kernel(%arg0: i32, %arg1: i32, %arg2: memref<2x4x256xf32, #tpu.memory_space<vmem>>, %arg3: memref<2x4xbf16, #tpu.memory_space<vmem>>, %arg4: memref<2x4xbf16, #tpu.memory_space<vmem>>) attributes {dimension_semantics = [#tpu.dimension_semantics<parallel>, #tpu.dimension_semantics<parallel>], iteration_bounds = array<i64: 1, 1>, scalar_prefetch = 0 : i64, scratch_operands = 0 : i64, tpu.core_type = #tpu.core_type<tc>, window_params = [{transform_indices = @transform_0, window_bounds = array<i64: 2, 4, 256>}, {transform_indices = @transform_1, window_bounds = array<i64: 2, 4>}, {transform_indices = @transform_2, window_bounds = array<i64: 2, 4>}]} {
    %c0 = arith.constant 0 : index
    %c0_0 = arith.constant 0 : index
    %c0_1 = arith.constant 0 : index
    %0 = vector.load %arg2[%c0, %c0_0, %c0_1] : memref<2x4x256xf32, #tpu.memory_space<vmem>>, vector<2x4x256xf32>
    %cst = arith.constant dense<0.000000e+00> : vector<2x4xf32>
    %1 = vector.multi_reduction <add>, %0, %cst [2] : vector<2x4x256xf32> to vector<2x4xf32>
    %cst_2 = arith.constant 2.560000e+02 : f32
    %2 = vector.broadcast %cst_2 : f32 to vector<2x4xf32>
    %3 = arith.divf %1, %2 : vector<2x4xf32>
    %4 = arith.truncf %3 : vector<2x4xf32> to vector<2x4xbf16>
    %c0_3 = arith.constant 0 : index
    %c0_4 = arith.constant 0 : index
    %5 = vector.load %arg3[%c0_3, %c0_4] : memref<2x4xbf16, #tpu.memory_space<vmem>>, vector<2x4xbf16>
    tpu.vector_store %arg3[%c0_3, %c0_4], %4 {strides = array<i32>} : memref<2x4xbf16, #tpu.memory_space<vmem>>, vector<2x4xbf16>,
    %cst_5 = arith.constant dense<0xFF800000> : vector<2x4xf32>
    %6 = vector.multi_reduction <maximumf>, %0, %cst_5 [2] : vector<2x4x256xf32> to vector<2x4xf32>
    %7 = arith.truncf %6 : vector<2x4xf32> to vector<2x4xbf16>
    %c0_6 = arith.constant 0 : index
    %c0_7 = arith.constant 0 : index
    %8 = vector.load %arg4[%c0_6, %c0_7] : memref<2x4xbf16, #tpu.memory_space<vmem>>, vector<2x4xbf16>
    tpu.vector_store %arg4[%c0_6, %c0_7], %7 {strides = array<i32>} : memref<2x4xbf16, #tpu.memory_space<vmem>>, vector<2x4xbf16>,
    return
  }
  func.func @transform_0(%arg0: i32, %arg1: i32) -> (i32, i32, i32) {
    %c0_i32 = arith.constant 0 : i32
    %c0_i32_0 = arith.constant 0 : i32
    return %arg0, %arg1, %c0_i32 : i32, i32, i32
  }
  func.func @transform_1(%arg0: i32, %arg1: i32) -> (i32, i32) {
    %c0_i32 = arith.constant 0 : i32
    return %arg0, %arg1 : i32, i32
  }
  func.func @transform_2(%arg0: i32, %arg1: i32) -> (i32, i32) {
    %c0_i32 = arith.constant 0 : i32
    return %arg0, %arg1 : i32, i32
  }
}

</mosaic_0001>

<bundles_post_ra>
// kernel: tpu_custom_call.1
= control target key start
LH: loop header
LB: loop body
LE: loop exit
PB: predicated region body
PF: predicated region fallthrough
CT: control target
= control target key end

     0   :  { %8 = vsyncpa [#allocation3], 0  ;;  %s432_s0 = inlined_call_operand.hbm [shape: f32[2,4,256], index: 0, kind: input, shape index: {}]   ;;  %s433_s1 = inlined_call_operand.hbm [shape: bf16[2,4], index: 1, kind: output, shape index: {0}]   ;;  %s434_s2 = inlined_call_operand.hbm [shape: bf16[2,4], index: 2, kind: output, shape index: {1}]  }
   0x1   :  { %9 = vsyncpa [#allocation4], 0 }
   0x2   :  { %10 = vsyncpa [#allocation7], 0  ;;  %s371_s9 = smov [#allocation2]   ;;  %s299_s13 = scalar_lea.hbm %s432_s0, 256 }
   0x3   :  { %s16_s10 = sshll.u32 %s371_s9, 4  ;;  %p300_p0 = scmp.ne.s32.totalorder %s432_s0, %s299_s13  ;;  %s17_s10 = int_to_ptr.vmem [resolvable:$true] %s16_s10 }
   0x4   :  { %p303_p1 = scmp.lt.u32.totalorder %s299_s13, %s432_s0 }
   0x6   :  { %p305_p2 = pnand %p303_p1, %p300_p0 }
   0x8   :  { %308 = shalt.err (!%p305_p2)
}
   0x9   :  { %s309_s18 = scalar_lea.vmem %s17_s10, 256  ;;  %p314_p4 = scmp.lt.s32.totalorder %s17_s10, %s17_s10 }
   0xa   :  { %p310_p3 = scmp.ne.s32.totalorder %s17_s10, %s309_s18  ;;  %p315_p5 = scmp.lt.s32.totalorder %s309_s18, %s309_s18 }
   0xc   :  { %p316_p6 = por %p315_p5, %p314_p4 }
   0xe   :  { %p317_p7 = pnand %p316_p6, %p310_p3 }
  0x10   :  { %320 = shalt.err (!%p317_p7)
}
  0x11   :  { %s372_s19 = smov 128   ;;  %s373_s20 = smov 8  }
  0x12   :  { %22 = dma.hbm_to_vmem [thread:$0]  %s432_s0, 256, %s17_s10, [#allocation3], %s372_s19, %s372_s19, %s373_s20  }
  0x13   :  { %365 = dma.done.wait [#allocation3], 256  }
  0x14   :  { %366 = vsyncadd [#allocation3], 4294967040  ;;  %vm34_vm0 = vcmask 1043456   ;;  %v26_v0 = vld [vmem:[#allocation2] sm:$0xff]  ;;  %v27_v1 = vld [vmem:[#allocation2 + $0x8] sm:$0xff]  ;;  %v374_v16 = vmov 0   ;;  %v52_v17 = vlaneseq }
  0x15   :  { %v30_v2 = vcombine.high %v26_v0, %v26_v0  ;;  %v35_v3 = vsel %vm34_vm0, %v26_v0, 0.0  ;;  %v150_v4 = vsel %vm34_vm0, %v26_v0, -inf  ;;  %v31_v5 = vcombine.high %v27_v1, %v27_v1  ;;  %296 = vset.pattern.permute.xlu1 %v374_v16  ;;  %295 = vset.pattern.permute.xlu0 %v374_v16  ;;  %s377_s0 = smov [#allocation5]   ;;  %s378_s24 = smov [#allocation6]  }
  0x16   :  { %v40_v6 = vsel %vm34_vm0, %v27_v1, 0.0  ;;  %v155_v7 = vsel %vm34_vm0, %v27_v1, -inf  ;;  %v375_v18 = vmov 1935823168   ;;  %v53_v20 = vshrl.u32 %v52_v17, 7  ;;  %s264_s23 = sshll.u32 %s377_s0, 4  ;;  %s265_s23 = int_to_ptr.vmem [resolvable:$true] %s264_s23 }
  0x17   :  { %v36_v8 = vsel %vm34_vm0, %v30_v2, 0.0  ;;  %v151_v9 = vsel %vm34_vm0, %v30_v2, -inf  ;;  %v41_v10 = vsel %vm34_vm0, %v31_v5, 0.0  ;;  %v156_v11 = vsel %vm34_vm0, %v31_v5, -inf  ;;  %s274_s25 = sshll.u32 %s378_s24, 4  ;;  %s321_s26 = scalar_lea.vmem %s265_s23, 16  ;;  %s275_s25 = int_to_ptr.vmem [resolvable:$true] %s274_s25 }
  0x18   :  { %v37_v12 = vadd.f32 %v36_v8, %v35_v3  ;;  %v152_v13 = vmax.f32 %v150_v4, %v151_v9  ;;  %v42_v14 = vadd.f32 %v41_v10, %v40_v6  ;;  %v157_v15 = vmax.f32 %v155_v7, %v156_v11  ;;  %p322_p8 = scmp.ne.s32.totalorder %s265_s23, %s321_s26  ;;  %s325_s27 = scalar_lea.vmem %s265_s23, 32 }
  0x19   :  { %v69_v19 = vunpack.c.l.s4 %v375_v18  ;;  %v54_v22 = vsub.s32 0, %v53_v20  ;;  %v58_v23 = vsub.s32 1, %v53_v20  ;;  %v121_v63 = vand.u32 127, %v52_v17  ;;  %p326_p9 = scmp.lt.s32.totalorder %s265_s23, %s265_s23  ;;  %p327_p10 = scmp.lt.s32.totalorder %s325_s27, %s321_s26 }
  0x1a   :  { %38 = vadd.xlane.f32.xlu0 %v37_v12  ;;  %153 = vmax.xlane.f32.xlu1 %v152_v13  ;;  %v376_v1 = vmov 1966171168   ;;  %vm130_vm1 = vcmask 1041409   ;;  %vm148_vm2 = vcmask 24576  }
  0x1b   :  { %v70_v21 = vunpack.c.0.s8 %v69_v19  ;;  %v134_v2 = vunpack.c.l.s4 %v376_v1  ;;  %v124_v3 = vsub.s32 %v121_v63, %v53_v20  ;;  %p328_p11 = por %p327_p10, %p326_p9 }
  0x1d   :  { %v73_v26 = vsub.s32 %v70_v21, %v53_v20  ;;  %v135_v5 = vunpack.c.0.s8 %v134_v2  ;;  %p329_p12 = pnand %p328_p11, %p322_p8 }
  0x1e   :  { %43 = vadd.xlane.f32.xlu0 %v42_v14  ;;  %158 = vmax.xlane.f32.xlu1 %v157_v15 }
  0x1f   :  { %v138_v9 = vsub.s32 %v135_v5, %v53_v20 }
  0xa7   :  { %v39_v24 = vpop.xlane.xlu0 %38  ;;  %v154_v25 = vpop.xlane.xlu1 %153 }
  0xa8   :  { %v46_v27 = vmul.f32 0.00390625, %v39_v24  ;;  %v160_v28 = vpack.c.bf16 %v154_v25, %v154_v25 }
  0xaa   :  { %v48_v29 = vpack.c.bf16 %v46_v27, %v46_v27  ;;  %v167_v30 = vrot.slane %v160_v28, %v54_v22  ;;  %v171_v31 = vrot.slane %v160_v28, %v58_v23 }
  0xab   :  { %v44_v32 = vpop.xlane.xlu0 %43  ;;  %v159_v33 = vpop.xlane.xlu1 %158 }
  0xac   :  { %v55_v34 = vrot.slane %v48_v29, %v54_v22  ;;  %v59_v35 = vrot.slane %v48_v29, %v58_v23  ;;  %v186_v36 = vrot.slane %v167_v30, %v73_v26  ;;  %v193_v37 = vrot.slane %v171_v31, %v73_v26 }
  0xad   :  { %v47_v38 = vmul.f32 0.00390625, %v44_v32  ;;  %v161_v39 = vpack.c.bf16 %v159_v33, %v159_v33 }
  0xae   :  { %v74_v40 = vrot.slane %v55_v34, %v73_v26  ;;  %v81_v41 = vrot.slane %v59_v35, %v73_v26  ;;  %v194_v42 = vcombine.low %v186_v36, %v193_v37 }
  0xaf   :  { %v49_v43 = vpack.c.bf16 %v47_v38, %v47_v38  ;;  %v175_v44 = vrot.slane %v161_v39, %v54_v22  ;;  %v179_v45 = vrot.slane %v161_v39, %v58_v23 }
  0xb0   :  { %v201_v46 = vrot.slane %v194_v42, %v73_v26  ;;  %v82_v47 = vcombine.low %v74_v40, %v81_v41 }
  0xb1   :  { %v63_v48 = vrot.slane %v49_v43, %v54_v22  ;;  %v67_v49 = vrot.slane %v49_v43, %v58_v23  ;;  %v208_v50 = vrot.slane %v175_v44, %v73_v26  ;;  %v215_v51 = vrot.slane %v179_v45, %v73_v26 }
  0xb2   :  { %v224_v52 = vunpack.c.l.b16 %v201_v46  ;;  %v89_v53 = vrot.slane %v82_v47, %v73_v26 }
  0xb3   :  { %v96_v54 = vrot.slane %v63_v48, %v73_v26  ;;  %v103_v55 = vrot.slane %v67_v49, %v73_v26  ;;  %v216_v56 = vcombine.low %v208_v50, %v215_v51 }
  0xb4   :  { %227 = vperm.xlu1 %296, %v224_v52   ;;  %v112_v57 = vunpack.c.l.b16 %v89_v53 }
  0xb5   :  { %v104_v58 = vcombine.low %v96_v54, %v103_v55  ;;  %v223_v60 = vrot.slane %v216_v56, %v73_v26 }
  0xb6   :  { %115 = vperm.xlu0 %295, %v112_v57  }
  0xb7   :  { %v111_v59 = vrot.slane %v104_v58, %v73_v26  ;;  %v225_v62 = vunpack.c.l.b16 %v223_v60 }
  0xb9   :  { %v113_v61 = vunpack.c.l.b16 %v111_v59 }
  0xbb   :  { %118 = vperm.xlu1 %296, %v113_v61  }
  0xbf   :  { %230 = vperm.xlu1 %296, %v225_v62  }
 0x133   :  { %v228_v0 = vpop.permute.xlu1 %227 }
 0x134   :  { %v235_v13 = vrot.slane %v228_v0, %v124_v3 }
 0x135   :  { %v116_v4 = vpop.permute.xlu0 %115 }
 0x136   :  { %v125_v7 = vrot.slane %v116_v4, %v124_v3 }
 0x13a   :  { %v119_v6 = vpop.permute.xlu1 %118 }
 0x13b   :  { %v129_v8 = vrot.slane %v119_v6, %v124_v3 }
 0x13d   :  { %v131_v10 = vsel %vm130_vm1, %v129_v8, %v125_v7 }
 0x13e   :  { %v132_v11 = vpack.c.b16 %v131_v10, %v131_v10  ;;  %v231_v12 = vpop.permute.xlu1 %230 }
 0x13f   :  { %v239_v14 = vrot.slane %v231_v12, %v124_v3 }
 0x140   :  { %v139_v15 = vrot.slane %v132_v11, %v138_v9 }
 0x141   :  { %v240_v16 = vsel %vm130_vm1, %v239_v14, %v235_v13 }
 0x142   :  { %v241_v17 = vpack.c.b16 %v240_v16, %v240_v16  ;;  %v146_v18 = vrot.slane %v139_v15, %v138_v9 }
 0x144   :  { %v248_v19 = vrot.slane %v241_v17, %v138_v9  ;;  %149 = vst.msk [vmem:[#allocation5] sm:$0x1] %vm148_vm2, %v146_v18 }
 0x145   :  { %332 = shalt.err (!%p329_p12)
}
 0x146   :  { %s333_s30 = scalar_lea.hbm %s433_s1, 16 }
 0x147   :  { %p334_p13 = scmp.ne.s32.totalorder %s433_s1, %s333_s30  ;;  %p337_p0 = scmp.lt.u32.totalorder %s333_s30, %s433_s1 }
 0x149   :  { %p339_p1 = pnand %p337_p0, %p334_p13 }
 0x14b   :  { %342 = shalt.err (!%p339_p1)
}
 0x14c   :  { %267 = dma.vmem_to_hbm [thread:$0]  %s265_s23, 16, %s433_s1, [#allocation4]   ;;  %v255_v20 = vrot.slane %v248_v19, %v138_v9 }
 0x14d   :  { %s343_s9 = scalar_lea.vmem %s275_s25, 16  ;;  %s347_s10 = scalar_lea.vmem %s275_s25, 32 }
 0x14e   :  { %257 = vst.msk [vmem:[#allocation6] sm:$0x1] %vm148_vm2, %v255_v20  ;;  %p344_p2 = scmp.ne.s32.totalorder %s275_s25, %s343_s9  ;;  %p348_p3 = scmp.lt.s32.totalorder %s275_s25, %s275_s25 }
 0x14f   :  { %p349_p4 = scmp.lt.s32.totalorder %s347_s10, %s343_s9 }
 0x151   :  { %p350_p5 = por %p349_p4, %p348_p3 }
 0x153   :  { %p351_p6 = pnand %p350_p5, %p344_p2 }
 0x155   :  { %354 = shalt.err (!%p351_p6)
}
 0x156   :  { %s355_s13 = scalar_lea.hbm %s434_s2, 16 }
 0x157   :  { %p356_p7 = scmp.ne.s32.totalorder %s434_s2, %s355_s13  ;;  %p359_p8 = scmp.lt.u32.totalorder %s355_s13, %s434_s2 }
 0x159   :  { %p361_p9 = pnand %p359_p8, %p356_p7 }
 0x15b   :  { %364 = shalt.err (!%p361_p9)
}
 0x15c   :  { %277 = dma.vmem_to_hbm [thread:$0]  %s275_s25, 16, %s434_s2, [#allocation7]  }
 0x15d   :  { %367 = dma.done.wait [#allocation4], 16  }
 0x15e   :  { %368 = vsyncadd [#allocation4], 4294967280 }
 0x15f   :  { %369 = dma.done.wait [#allocation7], 16  }
 0x160   :  { %370 = vsyncadd [#allocation7], 4294967280 }
 0x161   :  { %284 = vsyncpa [#allocation3], 1 }
 0x162   :  { %285 = vsyncpa [#allocation4], 1 }
 0x163   :  { %286 = vsyncpa [#allocation7], 1 }

</bundles_post_ra>
